<compile_context>
chip_gen: v7x
topology: tpu7x:2x2x1
jax: 0.10.0
libtpu: 0.0.40
codegen_flags: <defaults>
</compile_context>

<pallas_src>
import jax
import jax.numpy as jnp
from jax.experimental import pallas as pl
from jax.experimental.pallas import tpu as pltpu


def _h_swish_kernel(x_ref, o_ref):
    x = x_ref[...]
    # h_swish(x) = x * relu6(x + 3) / 6  ==  x * clamp(x + 3, 0, 6) * (1/6)
    y = x * jnp.clip(x + 3.0, 0.0, 6.0) * (1.0 / 6.0)
    o_ref[...] = y.astype(o_ref.dtype)


_LANE_CANDIDATES = (2048, 1024, 512, 256, 128)
# ~2 MiB per block: big enough to sit near the HBM roofline, small enough that
# the 2x-input + 2x-output double-buffered footprint (~8 MiB) stays well under
# v5e's 16 MiB scoped-VMEM default (and trivially under v6e/v7x limits).
_TARGET_BLOCK_BYTES = 2 * 1024 * 1024


def h_swish(x: jax.Array) -> jax.Array:
    """Elementwise hard-swish, semantics identical to torch x * ReLU6(x+3)/6.

    Accepts any shape (e.g. NCHW). Views the tensor as a lane-dense 2D slab
    (rows, LANE) with LANE a wide multiple of 128 and tiles over rows with a
    1-D parallel grid. No whole-array pad/slice unless the element count is
    not a multiple of 128 (rare fallback).
    """
    orig_shape = x.shape
    orig_dtype = x.dtype
    n = x.size
    if n == 0:
        return x

    itemsize = jnp.dtype(orig_dtype).itemsize
    flat = x.reshape(-1)

    # Widest lane dim that divides n exactly -> zero-copy reshape to a slab.
    lane = None
    for cand in _LANE_CANDIDATES:
        if n % cand == 0:
            lane = cand
            break

    padded = n
    if lane is None:
        # Fallback for sizes not divisible by 128: pad minimally (one copy).
        lane = 512 if n >= 512 else 128
        padded = pl.cdiv(n, lane) * lane
        flat = jnp.pad(flat, (0, padded - n))

    rows = padded // lane
    slab = flat.reshape(rows, lane)

    # Sublane packing: 8 rows for 32-bit dtypes, 16 for bf16/f16, 32 for 8-bit.
    sublane = max(8, 32 // itemsize)

    target_rows = max(sublane, _TARGET_BLOCK_BYTES // (lane * itemsize))
    block_rows = (target_rows // sublane) * sublane
    if block_rows >= rows:
        block_rows = rows  # single block spanning the full row dim (always legal)
    n_tiles = pl.cdiv(rows, block_rows)  # ragged last block: OOB reads padded, writes masked

    out = pl.pallas_call(
        _h_swish_kernel,
        out_shape=jax.ShapeDtypeStruct(slab.shape, orig_dtype),
        grid_spec=pltpu.PrefetchScalarGridSpec(
            num_scalar_prefetch=0,
            grid=(n_tiles,),
            in_specs=[pl.BlockSpec((block_rows, lane), lambda i: (i, 0))],
            out_specs=pl.BlockSpec((block_rows, lane), lambda i: (i, 0)),
        ),
        compiler_params=pltpu.CompilerParams(
            dimension_semantics=("parallel",),
        ),
        cost_estimate=pl.CostEstimate(
            flops=3 * n, transcendentals=0, bytes_accessed=2 * n * itemsize
        ),
    )(slab)

    flat_out = out.reshape(-1)
    if padded != n:
        flat_out = flat_out[:n]
    return flat_out.reshape(orig_shape)


def h_swish_ref(x: jax.Array) -> jax.Array:
    # Pure-JAX reference matching the PyTorch module exactly.
    return x * jnp.clip(x + 3.0, 0.0, 6.0) / 6.0


if __name__ == "__main__":
    key = jax.random.PRNGKey(0)

    # NCHW input consistent with the conv-net context of MAUNet.
    x = jax.random.normal(key, (2, 4, 16, 16), dtype=jnp.float32) * 4.0
    y = jax.block_until_ready(h_swish(x))
    y_ref = h_swish_ref(x)
    assert y.shape == x.shape and y.dtype == x.dtype
    assert jnp.allclose(y, y_ref, atol=1e-6, rtol=1e-6)

    # Also exercise the non-128-aligned fallback path once (tiny, cheap).
    x2 = jax.random.normal(jax.random.PRNGKey(1), (3, 5, 7, 11), dtype=jnp.float32) * 4.0
    y2 = jax.block_until_ready(h_swish(x2))
    assert y2.shape == x2.shape and y2.dtype == x2.dtype
    assert jnp.allclose(y2, h_swish_ref(x2), atol=1e-6, rtol=1e-6)

    print("KERNEL_OK")
</pallas_src>

<mosaic_0001>
module attributes {stable_mosaic.version = 11 : i64} {
  func.func @_h_swish_kernel(%arg0: i32, %arg1: memref<1x2048xf32, #tpu.memory_space<vmem>>, %arg2: memref<1x2048xf32, #tpu.memory_space<vmem>>) attributes {dimension_semantics = [#tpu.dimension_semantics<parallel>], iteration_bounds = array<i64: 1>, scalar_prefetch = 0 : i64, scratch_operands = 0 : i64, tpu.core_type = #tpu.core_type<tc>, window_params = [{transform_indices = @transform_0, window_bounds = array<i64: 1, 2048>}, {transform_indices = @transform_1, window_bounds = array<i64: 1, 2048>}]} {
    %c0 = arith.constant 0 : index
    %c0_0 = arith.constant 0 : index
    %0 = vector.load %arg1[%c0, %c0_0] : memref<1x2048xf32, #tpu.memory_space<vmem>>, vector<1x2048xf32>
    %cst = arith.constant 3.000000e+00 : f32
    %1 = vector.broadcast %cst : f32 to vector<1x2048xf32>
    %2 = arith.addf %0, %1 : vector<1x2048xf32>
    %cst_1 = arith.constant 0.000000e+00 : f32
    %cst_2 = arith.constant 6.000000e+00 : f32
    %3 = vector.broadcast %cst_1 : f32 to vector<1x2048xf32>
    %4 = arith.maximumf %3, %2 : vector<1x2048xf32>
    %5 = vector.broadcast %cst_2 : f32 to vector<1x2048xf32>
    %6 = arith.minimumf %5, %4 : vector<1x2048xf32>
    %7 = arith.mulf %0, %6 : vector<1x2048xf32>
    %cst_3 = arith.constant 0.166666672 : f32
    %8 = vector.broadcast %cst_3 : f32 to vector<1x2048xf32>
    %9 = arith.mulf %7, %8 : vector<1x2048xf32>
    %c0_4 = arith.constant 0 : index
    %c0_5 = arith.constant 0 : index
    %10 = vector.load %arg2[%c0_4, %c0_5] : memref<1x2048xf32, #tpu.memory_space<vmem>>, vector<1x2048xf32>
    tpu.vector_store %arg2[%c0_4, %c0_5], %9 {strides = array<i32>} : memref<1x2048xf32, #tpu.memory_space<vmem>>, vector<1x2048xf32>,
    return
  }
  func.func @transform_0(%arg0: i32) -> (i32, i32) {
    %c0_i32 = arith.constant 0 : i32
    %c0_i32_0 = arith.constant 0 : i32
    return %arg0, %c0_i32 : i32, i32
  }
  func.func @transform_1(%arg0: i32) -> (i32, i32) {
    %c0_i32 = arith.constant 0 : i32
    %c0_i32_0 = arith.constant 0 : i32
    return %arg0, %c0_i32 : i32, i32
  }
}

</mosaic_0001>

<bundles_post_ra>
// kernel: tpu_custom_call.1
= control target key start
LH: loop header
LB: loop body
LE: loop exit
PB: predicated region body
PF: predicated region fallthrough
CT: control target
= control target key end

     0   :  { %6 = vsyncpa [#allocation3], 0  ;;  %s136_s0 = inlined_call_operand.hbm [shape: f32[1,2048], index: 0, kind: input, shape index: {}]   ;;  %s137_s1 = inlined_call_operand.hbm [shape: f32[1,2048], index: 1, kind: output, shape index: {}]  }
   0x1   :  { %7 = vsyncpa [#allocation4], 0  ;;  %s100_s6 = smov [#allocation2]   ;;  %s52_s10 = scalar_lea.hbm %s136_s0, 256 }
   0x2   :  { %s14_s7 = sshll.u32 %s100_s6, 4  ;;  %p53_p0 = scmp.ne.s32.totalorder %s136_s0, %s52_s10  ;;  %s15_s7 = int_to_ptr.vmem [resolvable:$true] %s14_s7 }
   0x3   :  { %p56_p1 = scmp.lt.u32.totalorder %s52_s10, %s136_s0 }
   0x5   :  { %p58_p2 = pnand %p56_p1, %p53_p0 }
   0x7   :  { %61 = shalt.err (!%p58_p2)
}
   0x8   :  { %s62_s15 = scalar_lea.vmem %s15_s7, 256  ;;  %p67_p4 = scmp.lt.s32.totalorder %s15_s7, %s15_s7 }
   0x9   :  { %p63_p3 = scmp.ne.s32.totalorder %s15_s7, %s62_s15  ;;  %p68_p5 = scmp.lt.s32.totalorder %s62_s15, %s62_s15 }
   0xb   :  { %p69_p6 = por %p68_p5, %p67_p4 }
   0xd   :  { %p70_p7 = pnand %p69_p6, %p63_p3 }
   0xf   :  { %73 = shalt.err (!%p70_p7)
}
  0x10   :  { %17 = dma.hbm_to_vmem [thread:$0]  %s136_s0, 256, %s15_s7, [#allocation3]  }
  0x11   :  { %96 = dma.done.wait [#allocation3], 256  }
  0x12   :  { %97 = vsyncadd [#allocation3], 4294967040  ;;  %v21_v0 = vld [vmem:[#allocation2] sm:$0xff]  ;;  %v22_v1 = vld [vmem:[#allocation2 + $0x8] sm:$0xff]  ;;  %s101_s18 = smov [#allocation5]  }
  0x13   :  { %v23_v2 = vadd.f32 3.0, %v21_v0  ;;  %v24_v3 = vadd.f32 3.0, %v22_v1  ;;  %s41_s19 = sshll.u32 %s101_s18, 4  ;;  %s42_s19 = int_to_ptr.vmem [resolvable:$true] %s41_s19 }
  0x14   :  { %s74_s0 = scalar_lea.vmem %s42_s19, 256  ;;  %p79_p9 = scmp.lt.s32.totalorder %s42_s19, %s42_s19 }
  0x15   :  { %v25_v4 = vmax.f32 %v23_v2, 0.0  ;;  %v26_v5 = vmax.f32 %v24_v3, 0.0  ;;  %p75_p8 = scmp.ne.s32.totalorder %s42_s19, %s74_s0  ;;  %p80_p10 = scmp.lt.s32.totalorder %s74_s0, %s74_s0 }
  0x17   :  { %v27_v6 = vmin.f32 %v25_v4, 6.0  ;;  %v28_v7 = vmin.f32 %v26_v5, 6.0  ;;  %p81_p11 = por %p80_p10, %p79_p9 }
  0x19   :  { %v29_v8 = vmul.f32 %v27_v6, %v21_v0  ;;  %v30_v9 = vmul.f32 %v28_v7, %v22_v1  ;;  %p82_p12 = pnand %p81_p11, %p75_p8 }
  0x1b   :  { %v31_v10 = vmul.f32 0.16666667, %v29_v8  ;;  %v32_v11 = vmul.f32 0.16666667, %v30_v9 }
  0x1d   :  { %33 = vst [vmem:[#allocation5] sm:$0xff] %v31_v10  ;;  %34 = vst [vmem:[#allocation5 + $0x8] sm:$0xff] %v32_v11 }
  0x1e   :  { %85 = shalt.err (!%p82_p12)
}
  0x1f   :  { %s86_s22 = scalar_lea.hbm %s137_s1, 256 }
  0x20   :  { %p87_p13 = scmp.ne.s32.totalorder %s137_s1, %s86_s22  ;;  %p90_p0 = scmp.lt.u32.totalorder %s86_s22, %s137_s1 }
  0x22   :  { %p92_p1 = pnand %p90_p0, %p87_p13 }
  0x24   :  { %95 = shalt.err (!%p92_p1)
}
  0x25   :  { %44 = dma.vmem_to_hbm [thread:$0]  %s42_s19, 256, %s137_s1, [#allocation4]  }
  0x26   :  { %98 = dma.done.wait [#allocation4], 256  }
  0x27   :  { %99 = vsyncadd [#allocation4], 4294967040 }
  0x28   :  { %48 = vsyncpa [#allocation3], 1 }
  0x29   :  { %49 = vsyncpa [#allocation4], 1 }

</bundles_post_ra>
